<compile_context>
chip_gen: v7x
topology: tpu7x:2x2x1
jax: 0.10.0
libtpu: 0.0.40
codegen_flags: <defaults>
</compile_context>

<pallas_src>
import functools

import jax
import jax.numpy as jnp
from jax.experimental import pallas as pl
from jax.experimental.pallas import tpu as pltpu


def _round_up(n, m):
    return ((n + m - 1) // m) * m


def _mlp_sigmoid_kernel(x_ref, w0_ref, b0_ref, w1_ref, b1_ref, w2_ref, b2_ref,
                        out_ref):
    # x_ref : (TB, D)   f32       w0_ref: (D,  H0) bf16   b0_ref: (1, H0) f32
    # w1_ref: (H0, H1)  bf16      b1_ref: (1, H1) f32
    # w2_ref: (1,  H1)  f32       b2_ref: (1, 1)  f32
    # out_ref: (1, TB)  f32   (lane-dense: batch on lanes)

    # In-kernel bf16 cast of the x tile (VPU, hidden under the x DMA shadow).
    x_bf = x_ref[...].astype(jnp.bfloat16)

    # Layer 0: Linear(input_dim -> hidden0) + ReLU   (bf16 MXU, f32 accumulate)
    h = jnp.dot(x_bf, w0_ref[...], preferred_element_type=jnp.float32)
    h = jnp.maximum(h + b0_ref[...], 0.0)

    # Layer 1: Linear(hidden0 -> hidden1) + ReLU
    h = jnp.dot(h.astype(jnp.bfloat16), w1_ref[...],
                preferred_element_type=jnp.float32)
    h = jnp.maximum(h + b1_ref[...], 0.0)

    # Head: Linear(hidden1 -> 1) + sigmoid, produced as a lane-dense (1, TB)
    # row.  NT-form contraction (w2 minor axis vs. h minor axis) -- the same
    # MXU-native pattern as q @ k^T -- so the full (TB, H1) h tile is not
    # transposed through the XLU, and we avoid (TB, 1) masked column stores.
    z = jax.lax.dot_general(
        w2_ref[...], h,
        dimension_numbers=(((1,), (1,)), ((), ())),
        preferred_element_type=jnp.float32)          # (1, TB)
    z = z + b2_ref[...]                               # (1, 1) broadcast
    out_ref[...] = jax.nn.sigmoid(z).astype(out_ref.dtype)


@functools.partial(jax.jit, static_argnames=("block_b",))
def logistic_regression_forward(x, params, *, block_b=4096):
    """x: (B, input_dim) f32; params: list of (W, b), W: (in, out), b: (1, out).

    Returns sigmoid(MLP(x)) of shape (B, 1), matching the PyTorch module.
    """
    (w0, b0), (w1, b1), (w2, b2) = params
    B, D = x.shape
    H0 = w0.shape[1]
    H1 = w1.shape[1]

    # Batch tile: multiple of 128 (lane-dense output + full MXU M-panels).
    #  * B <= 128 : one (possibly partial) block.
    #  * else     : big tile (<= block_b) but clamped so the grid keeps at
    #               least 2 steps (keeps both v7x TensorCores busy).
    if B <= 128:
        tb = _round_up(B, 128)
    else:
        tb = min(block_b, _round_up(-(-B // 2), 128))
    grid = (pl.cdiv(B, tb),)   # partial last block handled by Pallas, no pad

    # Weights/biases are tiny; one-time bf16 casts are negligible vs. x stream.
    w0_bf = w0.astype(jnp.bfloat16)
    w1_bf = w1.astype(jnp.bfloat16)
    w2_row = w2.reshape(1, H1).astype(jnp.float32)    # head weight as a row
    b2_s = b2.reshape(1, 1).astype(jnp.float32)

    out_row = pl.pallas_call(
        _mlp_sigmoid_kernel,
        out_shape=jax.ShapeDtypeStruct((1, B), jnp.float32),
        grid=grid,
        in_specs=[
            # x: f32, tiled along batch, double-buffered by the pipeline.
            pl.BlockSpec((tb, D), lambda i: (i, 0)),
            # Weights / biases: same block every step -> resident in VMEM.
            pl.BlockSpec((D, H0), lambda i: (0, 0)),
            pl.BlockSpec((1, H0), lambda i: (0, 0)),
            pl.BlockSpec((H0, H1), lambda i: (0, 0)),
            pl.BlockSpec((1, H1), lambda i: (0, 0)),
            pl.BlockSpec((1, H1), lambda i: (0, 0)),
            pl.BlockSpec((1, 1), lambda i: (0, 0)),
        ],
        out_specs=pl.BlockSpec((1, tb), lambda i: (0, i)),
        compiler_params=pltpu.CompilerParams(
            dimension_semantics=("parallel",),        # megacore on v7x
            # Explicit: above v5e's 16 MiB scoped default, equal to the
            # v7x default; double-buffered x tiles fit easily on all gens.
            vmem_limit_bytes=32 * 1024 * 1024,
        ),
    )(x, w0_bf, b0, w1_bf, b1, w2_row, b2_s)

    return out_row[0, :].reshape(B, 1)


def init_params(key, input_dim, hidden_dims):
    """nn.Linear-style init (uniform +-1/sqrt(fan_in)); W stored as (in, out)."""
    dims = [input_dim] + list(hidden_dims) + [1]
    params = []
    for i in range(len(dims) - 1):
        fan_in, fan_out = dims[i], dims[i + 1]
        key, kw, kb = jax.random.split(key, 3)
        bound = 1.0 / (fan_in ** 0.5)
        w = jax.random.uniform(kw, (fan_in, fan_out), jnp.float32, -bound, bound)
        b = jax.random.uniform(kb, (1, fan_out), jnp.float32, -bound, bound)
        params.append((w, b))
    return params


def reference_forward_f32(x, params):
    """Pure f32 reference matching the PyTorch module."""
    h = x
    for w, b in params[:-1]:
        h = jnp.maximum(h @ w + b, 0.0)
    w, b = params[-1]
    return jax.nn.sigmoid(h @ w + b)


def reference_forward_matched(x, params):
    """Reference applying the same bf16 casts as the kernel (tight check)."""
    (w0, b0), (w1, b1), (w2, b2) = params
    h = jnp.dot(x.astype(jnp.bfloat16), w0.astype(jnp.bfloat16),
                preferred_element_type=jnp.float32)
    h = jnp.maximum(h + b0, 0.0)
    h = jnp.dot(h.astype(jnp.bfloat16), w1.astype(jnp.bfloat16),
                preferred_element_type=jnp.float32)
    h = jnp.maximum(h + b1, 0.0)
    return jax.nn.sigmoid(h @ w2 + b2)


if __name__ == "__main__":
    key = jax.random.PRNGKey(0)
    # Small shapes; B=300 deliberately exercises a 2-step grid with a ragged
    # (partial) last block on both the x tile and the lane-dense output.
    batch, input_dim = 300, 32
    hidden_dims = [64, 32]

    k_x, k_p = jax.random.split(key)
    x = jax.random.normal(k_x, (batch, input_dim), jnp.float32)
    params = init_params(k_p, input_dim, hidden_dims)

    out = logistic_regression_forward(x, params)
    out = jax.block_until_ready(out)
    assert out.shape == (batch, 1), out.shape

    # Tight check vs a reference with identical bf16 casts.
    ref_matched = reference_forward_matched(x, params)
    assert jnp.allclose(out, ref_matched, atol=2e-3, rtol=2e-3), (
        float(jnp.max(jnp.abs(out - ref_matched))))

    # Loose check vs the pure-f32 PyTorch-equivalent forward
    # (bf16 matmul inputs => relaxed tolerance).
    ref_f32 = reference_forward_f32(x, params)
    assert jnp.allclose(out, ref_f32, atol=5e-2, rtol=5e-2), (
        float(jnp.max(jnp.abs(out - ref_f32))))

    print("KERNEL_OK")
</pallas_src>

<mosaic_0001>
module attributes {stable_mosaic.version = 11 : i64} {
  func.func @_mlp_sigmoid_kernel(%arg0: i32, %arg1: memref<256x32xf32, #tpu.memory_space<vmem>>, %arg2: memref<32x64xbf16, #tpu.memory_space<vmem>>, %arg3: memref<1x64xf32, #tpu.memory_space<vmem>>, %arg4: memref<64x32xbf16, #tpu.memory_space<vmem>>, %arg5: memref<1x32xf32, #tpu.memory_space<vmem>>, %arg6: memref<1x32xf32, #tpu.memory_space<vmem>>, %arg7: memref<1x1xf32, #tpu.memory_space<vmem>>, %arg8: memref<1x256xf32, #tpu.memory_space<vmem>>) attributes {dimension_semantics = [#tpu.dimension_semantics<parallel>], iteration_bounds = array<i64: 2>, scalar_prefetch = 0 : i64, scratch_operands = 0 : i64, tpu.core_type = #tpu.core_type<tc>, window_params = [{transform_indices = @transform_0, window_bounds = array<i64: 256, 32>}, {pipeline_mode = #tpu.pipeline_mode<synchronous>, transform_indices = @transform_1, window_bounds = array<i64: 32, 64>}, {pipeline_mode = #tpu.pipeline_mode<synchronous>, transform_indices = @transform_2, window_bounds = array<i64: 1, 64>}, {pipeline_mode = #tpu.pipeline_mode<synchronous>, transform_indices = @transform_3, window_bounds = array<i64: 64, 32>}, {pipeline_mode = #tpu.pipeline_mode<synchronous>, transform_indices = @transform_4, window_bounds = array<i64: 1, 32>}, {pipeline_mode = #tpu.pipeline_mode<synchronous>, transform_indices = @transform_5, window_bounds = array<i64: 1, 32>}, {pipeline_mode = #tpu.pipeline_mode<synchronous>, transform_indices = @transform_6, window_bounds = array<i64: 1, 1>}, {transform_indices = @transform_7, window_bounds = array<i64: 1, 256>}]} {
    %c0 = arith.constant 0 : index
    %c0_0 = arith.constant 0 : index
    %0 = vector.load %arg1[%c0, %c0_0] : memref<256x32xf32, #tpu.memory_space<vmem>>, vector<256x32xf32>
    %1 = arith.truncf %0 : vector<256x32xf32> to vector<256x32xbf16>
    %c0_1 = arith.constant 0 : index
    %c0_2 = arith.constant 0 : index
    %2 = vector.load %arg2[%c0_1, %c0_2] : memref<32x64xbf16, #tpu.memory_space<vmem>>, vector<32x64xbf16>
    %cst = arith.constant dense<0.000000e+00> : vector<256x64xf32>
    %3 = tpu.matmul %1, %2, %cst {dimension_numbers = #tpu.dot_dimension_numbers<[1], [0], [0], [1], [0, 0, 1, 1], [], []>} : vector<256x32xbf16>, vector<32x64xbf16>, vector<256x64xf32> -> vector<256x64xf32>
    %c0_3 = arith.constant 0 : index
    %c0_4 = arith.constant 0 : index
    %4 = vector.load %arg3[%c0_3, %c0_4] : memref<1x64xf32, #tpu.memory_space<vmem>>, vector<1x64xf32>
    %5 = vector.broadcast %4 : vector<1x64xf32> to vector<256x64xf32>
    %6 = arith.addf %3, %5 : vector<256x64xf32>
    %cst_5 = arith.constant 0.000000e+00 : f32
    %7 = vector.broadcast %cst_5 : f32 to vector<256x64xf32>
    %8 = arith.maximumf %6, %7 : vector<256x64xf32>
    %9 = arith.truncf %8 : vector<256x64xf32> to vector<256x64xbf16>
    %c0_6 = arith.constant 0 : index
    %c0_7 = arith.constant 0 : index
    %10 = vector.load %arg4[%c0_6, %c0_7] : memref<64x32xbf16, #tpu.memory_space<vmem>>, vector<64x32xbf16>
    %cst_8 = arith.constant dense<0.000000e+00> : vector<256x32xf32>
    %11 = tpu.matmul %9, %10, %cst_8 {dimension_numbers = #tpu.dot_dimension_numbers<[1], [0], [0], [1], [0, 0, 1, 1], [], []>} : vector<256x64xbf16>, vector<64x32xbf16>, vector<256x32xf32> -> vector<256x32xf32>
    %c0_9 = arith.constant 0 : index
    %c0_10 = arith.constant 0 : index
    %12 = vector.load %arg5[%c0_9, %c0_10] : memref<1x32xf32, #tpu.memory_space<vmem>>, vector<1x32xf32>
    %13 = vector.broadcast %12 : vector<1x32xf32> to vector<256x32xf32>
    %14 = arith.addf %11, %13 : vector<256x32xf32>
    %cst_11 = arith.constant 0.000000e+00 : f32
    %15 = vector.broadcast %cst_11 : f32 to vector<256x32xf32>
    %16 = arith.maximumf %14, %15 : vector<256x32xf32>
    %c0_12 = arith.constant 0 : index
    %c0_13 = arith.constant 0 : index
    %17 = vector.load %arg6[%c0_12, %c0_13] : memref<1x32xf32, #tpu.memory_space<vmem>>, vector<1x32xf32>
    %cst_14 = arith.constant dense<0.000000e+00> : vector<1x256xf32>
    %18 = tpu.matmul %17, %16, %cst_14 {dimension_numbers = #tpu.dot_dimension_numbers<[1], [1], [0], [0], [0, 0, 1, 0], [], []>} : vector<1x32xf32>, vector<256x32xf32>, vector<1x256xf32> -> vector<1x256xf32>
    %c0_15 = arith.constant 0 : index
    %c0_16 = arith.constant 0 : index
    %19 = vector.load %arg7[%c0_15, %c0_16] : memref<1x1xf32, #tpu.memory_space<vmem>>, vector<1x1xf32>
    %20 = vector.broadcast %19 : vector<1x1xf32> to vector<1x256xf32>
    %21 = arith.addf %18, %20 : vector<1x256xf32>
    %22 = arith.negf %21 : vector<1x256xf32>
    %23 = math.exp %22 : vector<1x256xf32>
    %cst_17 = arith.constant 1.000000e+00 : f32
    %24 = vector.broadcast %cst_17 : f32 to vector<1x256xf32>
    %25 = arith.addf %24, %23 : vector<1x256xf32>
    %26 = arith.divf %24, %25 : vector<1x256xf32>
    %c0_18 = arith.constant 0 : index
    %c0_19 = arith.constant 0 : index
    %27 = vector.load %arg8[%c0_18, %c0_19] : memref<1x256xf32, #tpu.memory_space<vmem>>, vector<1x256xf32>
    tpu.vector_store %arg8[%c0_18, %c0_19], %26 {strides = array<i32>} : memref<1x256xf32, #tpu.memory_space<vmem>>, vector<1x256xf32>,
    return
  }
  func.func @transform_0(%arg0: i32) -> (i32, i32) {
    %c0_i32 = arith.constant 0 : i32
    %c0_i32_0 = arith.constant 0 : i32
    return %arg0, %c0_i32 : i32, i32
  }
  func.func @transform_1(%arg0: i32) -> (i32, i32) {
    %c0_i32 = arith.constant 0 : i32
    %c0_i32_0 = arith.constant 0 : i32
    %c0_i32_1 = arith.constant 0 : i32
    return %c0_i32, %c0_i32_0 : i32, i32
  }
  func.func @transform_2(%arg0: i32) -> (i32, i32) {
    %c0_i32 = arith.constant 0 : i32
    %c0_i32_0 = arith.constant 0 : i32
    %c0_i32_1 = arith.constant 0 : i32
    return %c0_i32, %c0_i32_0 : i32, i32
  }
  func.func @transform_3(%arg0: i32) -> (i32, i32) {
    %c0_i32 = arith.constant 0 : i32
    %c0_i32_0 = arith.constant 0 : i32
    %c0_i32_1 = arith.constant 0 : i32
    return %c0_i32, %c0_i32_0 : i32, i32
  }
  func.func @transform_4(%arg0: i32) -> (i32, i32) {
    %c0_i32 = arith.constant 0 : i32
    %c0_i32_0 = arith.constant 0 : i32
    %c0_i32_1 = arith.constant 0 : i32
    return %c0_i32, %c0_i32_0 : i32, i32
  }
  func.func @transform_5(%arg0: i32) -> (i32, i32) {
    %c0_i32 = arith.constant 0 : i32
    %c0_i32_0 = arith.constant 0 : i32
    %c0_i32_1 = arith.constant 0 : i32
    return %c0_i32, %c0_i32_0 : i32, i32
  }
  func.func @transform_6(%arg0: i32) -> (i32, i32) {
    %c0_i32 = arith.constant 0 : i32
    %c0_i32_0 = arith.constant 0 : i32
    %c0_i32_1 = arith.constant 0 : i32
    return %c0_i32, %c0_i32_0 : i32, i32
  }
  func.func @transform_7(%arg0: i32) -> (i32, i32) {
    %c0_i32 = arith.constant 0 : i32
    %c0_i32_0 = arith.constant 0 : i32
    return %c0_i32, %arg0 : i32, i32
  }
}

</mosaic_0001>

<bundles_post_ra>
// kernel: logistic_regression_forward.1
= control target key start
LH: loop header
LB: loop body
LE: loop exit
PB: predicated region body
PF: predicated region fallthrough
CT: control target
= control target key end

     0   :  { %s2007_s0 = inlined_call_operand.vmem [shape: f32[300,32], index: 0, kind: input, shape index: {}]   ;;  %s2008_s1 = inlined_call_operand.vmem [shape: bf16[32,64], index: 1, kind: input, shape index: {}]   ;;  %s2009_s2 = inlined_call_operand.vmem [shape: f32[1,64], index: 2, kind: input, shape index: {}]   ;;  %s2010_s3 = inlined_call_operand.vmem [shape: bf16[64,32], index: 3, kind: input, shape index: {}]   ;;  %s2011_s4 = inlined_call_operand.vmem [shape: f32[1,32], index: 4, kind: input, shape index: {}]   ;;  %s2012_s5 = inlined_call_operand.vmem [shape: f32[1,32], index: 5, kind: input, shape index: {}]   ;;  %s2013_s6 = inlined_call_operand.<no memory space> [shape: f32[1,1], index: 6, kind: input, shape index: {}]   ;;  %s2014_s7 = inlined_call_operand.hbm [shape: f32[1,300], index: 7, kind: output, shape index: {}]  }
   0x1   :  { %v12_v0 = vstv %s2013_s6 }
   0x2   :  { %13 = vst [vmem:[#allocation2] sm:$0x1] %v12_v0 }
   0x3   :  { %14 = vsyncpa [#allocation4], 0 }
   0x4   :  { %16 = vsyncpa [#allocation4 + $0x1], 0  ;;  %s1663_s26 = smov 0   ;;  %s1665_s27 = smov 0  }
   0x5   :  { %s1667_s28 = smov 0   ;;  %s1669_s29 = smov 0  }
   0x6 LB: > { %s1684_s6 = sadd.s32 4294967295, %s1615_s29   ;;  %s1212_s30 = sadd.s32 4294967294, %s1615_s29   ;;  %s1615_s29 = sphi %s1669_s29, %s2022_s29   ;;  %s1611_s28 = sphi %s1667_s28, %s2021_s28   ;;  %s1607_s27 = sphi %s1665_s27, %s2020_s27   ;;  %s1603_s26 = sphi %s1663_s26, %s2019_s26  }
   0x7   : > { %s1688_s8 = sadd.s32 1, %s1615_s29   ;;  %s181_s9 = sadd.s32 1, %s1611_s28 }
   0x8   : > { %s178_s10 = ssub.s32 %s1615_s29, %s1688_s8  ;;  %p191_p0 = scmp.ne.s32.totalorder %s1611_s28, %s1607_s27 }
   0x9   : > { %p179_p1 = scmp.eq.s32.totalorder %s178_s10, 0  ;;  %p192_p2 = scmp.eq.s32.totalorder %s1684_s6, 1 }
   0xa   : > { %p197_p3 = scmp.ne.s32.totalorder %s1607_s27, %s1603_s26  ;;  %p198_p4 = scmp.eq.s32.totalorder %s1212_s30, 1 }
   0xb   : > { %s1699_s11 = scalar_select %p179_p1, %s1611_s28, %s181_s9  }
   0xc   : > { %p1701_p5 = por %p192_p2, %p191_p0  ;;  %p1705_p6 = por %p198_p4, %p197_p3 }
   0xd   : > { %p1215_p7 = scmp.ge.s32.totalorder %s1615_s29, 1  ;;  %p251_p8 = scmp.lt.s32.totalorder %s1615_s29, 3 }
   0xf   : > { %p252_p9 = pnand %p1215_p7, %p251_p8 }
  0x10   : > { %v1539_v1 = vld [vmem:[%s2008_s1] sm:$0xff] (!%p252_p9)   ;;  %s1715_s16 = sshll.u32 (!%p252_p9), %s1684_s6, 5  ;;  %v1540_v2 = vld [vmem:[%s2008_s1 + $0x8] sm:$0xff] (!%p252_p9)   ;;  %vm378_vm0 = vcmask (!%p252_p9), 261120   ;;  %v1543_v53 = vld [vmem:[%s2010_s3 + $0x10] sm:$0xff] (!%p252_p9)   ;;  %vm675_vm1 = vcmask (!%p252_p9), 523264  }
  0x11   : > { %255 = sbr.rel (%p252_p9) target bundleno = 846 (0x34e), region = 48  ;;  %p292_p10 = scmp.lt.s32.totalorder (!%p252_p9), %s1715_s16, 37  ;;  %1374 = vmatprep.subr.bf16.mxu0 (!%p252_p9), %v1539_v1  ;;  %v1541_v3 = vld [vmem:[%s2010_s3] sm:$0xff] (!%p252_p9)   ;;  %v1542_v4 = vld [vmem:[%s2010_s3 + $0x8] sm:$0xff] (!%p252_p9)   ;;  %v1544_v54 = vld [vmem:[%s2010_s3 + $0x18] sm:$0xff] (!%p252_p9)  }
  0x12   : > { %1375 = vmatpush3.bf16.msra.mxu0 (!%p252_p9), %v1539_v1  ;;  %1410 = vmatprep.subr.bf16.mxu1 (!%p252_p9), %v1541_v3  ;;  %v1790_v55 = vld [vmem:[%s2009_s2] ss:$0 sm:$0xff] (!%p252_p9)  ;;  %vm1890_vm2 = vmpackc.low (!%p252_p9), %vm378_vm0, %vm378_vm0 }
  0x13   : > { %1376 = vmatprep.subr.bf16.mxu0 (!%p252_p9), %v1540_v2  ;;  %1411 = vmatpush3.bf16.msra.mxu1 (!%p252_p9), %v1541_v3 }
  0x14   : > { %1412 = vmatprep.subr.bf16.mxu1 (!%p252_p9), %v1542_v4 }
  0x16   : > { %1377 = vmatpush3.bf16.msra.mxu0 (!%p252_p9), %v1540_v2 }
  0x17   : > { %1413 = vmatpush3.bf16.msra.mxu1 (!%p252_p9), %v1542_v4 }
  0x18   : > { %s293_s21 = scalar_select %p292_p10, %s1715_s16, 37  ;;  %1414 = vmatprep.subr.bf16.mxu1 %v1543_v53 }
  0x19   : > { %s1295_s10 = sshll.u32 (%p1701_p5), %s1684_s6, 1 }
  0x1a   : > { %s1218_s24 = sshll.u32 %s293_s21, 3  ;;  %s1142_s14 = ssub.s32 (%p1701_p5), 3, %s1295_s10 }
  0x1b   : > { %s1731_s9 = scalar_lea.vmem %s2007_s0, %s1218_s24  ;;  %1415 = vmatpush3.bf16.msra.mxu1 %v1543_v53  ;;  %s284_s24 = sand.u32 1, %s1607_s27  }
  0x1c   : > { %v307_v5 = vld [vmem:[%s1731_s9] sm:$0xff]  ;;  %v308_v6 = vld [vmem:[%s1731_s9 + $0x8] sm:$0xff]  ;;  %v309_v7 = vld [vmem:[%s1731_s9 + $0x10] sm:$0xff]  ;;  %1416 = vmatprep.subr.bf16.mxu1 %v1544_v54  ;;  %s1216_s25 = sshll.u32 %s284_s24, 1  ;;  %p1143_p11 = scmp.lt.s32.totalorder (%p1701_p5), %s1142_s14, 2 }
  0x1d   : > { %v339_v8 = vpack.c.bf16 %v308_v6, %v307_v5  ;;  %v310_v9 = vld [vmem:[%s1731_s9 + $0x18] sm:$0xff]  ;;  %v311_v10 = vld [vmem:[%s1731_s9 + $0x20] sm:$0xff]  ;;  %v312_v11 = vld [vmem:[%s1731_s9 + $0x28] sm:$0xff]  ;;  %s286_s30 = scalar_lea.vmem [#allocation3], %s1216_s25 }
  0x1e   : > { %v340_v12 = vpack.c.bf16 %v310_v9, %v309_v7  ;;  %v341_v13 = vpack.c.bf16 %v312_v11, %v311_v10  ;;  %v313_v14 = vld [vmem:[%s1731_s9 + $0x30] sm:$0xff]  ;;  %v314_v15 = vld [vmem:[%s1731_s9 + $0x38] sm:$0xff]  ;;  %v315_v16 = vld [vmem:[%s1731_s9 + $0x40] sm:$0xff] }
  0x1f   : > { %1378 = vmatprep.mubr.msk.bf16.mxu0 %vm378_vm0, %v339_v8  ;;  %v316_v17 = vld [vmem:[%s1731_s9 + $0x48] sm:$0xff]  ;;  %v342_v18 = vpack.c.bf16 %v314_v15, %v313_v14  ;;  %v317_v20 = vld [vmem:[%s1731_s9 + $0x50] sm:$0xff]  ;;  %v318_v21 = vld [vmem:[%s1731_s9 + $0x58] sm:$0xff]  ;;  %1417 = vmatpush3.bf16.msra.mxu1 %v1544_v54 }
  0x20   : > { %1379 = vmatmul.mubr.msk.bf16.vlgmr.msra.gmra.mrb[0].mxu0 %vm378_vm0, %v340_v12  ;;  %v343_v19 = vpack.c.bf16 %v316_v17, %v315_v16  ;;  %v319_v22 = vld [vmem:[%s1731_s9 + $0x60] sm:$0xff]  ;;  %v320_v23 = vld [vmem:[%s1731_s9 + $0x68] sm:$0xff]  ;;  %v344_v24 = vpack.c.bf16 %v318_v21, %v317_v20  ;;  %v321_v26 = vld [vmem:[%s1731_s9 + $0x70] sm:$0xff] }
  0x21   : > { %1382 = vmatprep.mubr.msk.bf16.mxu0 %vm378_vm0, %v341_v13  ;;  %v345_v25 = vpack.c.bf16 %v320_v23, %v319_v22  ;;  %v322_v27 = vld [vmem:[%s1731_s9 + $0x78] sm:$0xff]  ;;  %v323_v28 = vld [vmem:[%s1731_s9 + $0x80] sm:$0xff]  ;;  %v324_v29 = vld [vmem:[%s1731_s9 + $0x88] sm:$0xff] }
  0x22   : > { %v346_v30 = vpack.c.bf16 %v322_v27, %v321_v26  ;;  %v347_v31 = vpack.c.bf16 %v324_v29, %v323_v28  ;;  %v325_v32 = vld [vmem:[%s1731_s9 + $0x90] sm:$0xff]  ;;  %v326_v33 = vld [vmem:[%s1731_s9 + $0x98] sm:$0xff]  ;;  %v327_v34 = vld [vmem:[%s1731_s9 + $0xa0] sm:$0xff] }
  0x23   : > { %v328_v35 = vld [vmem:[%s1731_s9 + $0xa8] sm:$0xff]  ;;  %v348_v36 = vpack.c.bf16 %v326_v33, %v325_v32  ;;  %v329_v38 = vld [vmem:[%s1731_s9 + $0xb0] sm:$0xff]  ;;  %v330_v39 = vld [vmem:[%s1731_s9 + $0xb8] sm:$0xff] }
  0x24   : > { %v349_v37 = vpack.c.bf16 %v328_v35, %v327_v34  ;;  %v331_v40 = vld [vmem:[%s1731_s9 + $0xc0] sm:$0xff]  ;;  %v332_v41 = vld [vmem:[%s1731_s9 + $0xc8] sm:$0xff]  ;;  %v350_v42 = vpack.c.bf16 %v330_v39, %v329_v38  ;;  %v333_v44 = vld [vmem:[%s1731_s9 + $0xd0] sm:$0xff] }
  0x25   : > { %v351_v43 = vpack.c.bf16 %v332_v41, %v331_v40  ;;  %v334_v45 = vld [vmem:[%s1731_s9 + $0xd8] sm:$0xff]  ;;  %v335_v46 = vld [vmem:[%s1731_s9 + $0xe0] sm:$0xff]  ;;  %v336_v47 = vld [vmem:[%s1731_s9 + $0xe8] sm:$0xff] }
  0x26   : > { %v352_v48 = vpack.c.bf16 %v334_v45, %v333_v44  ;;  %v353_v49 = vpack.c.bf16 %v336_v47, %v335_v46  ;;  %v337_v50 = vld [vmem:[%s1731_s9 + $0xf0] sm:$0xff]  ;;  %v338_v51 = vld [vmem:[%s1731_s9 + $0xf8] sm:$0xff]  ;;  %s1953_s9 = scalar_lea.sflag [#allocation4], %s284_s24 }
  0x27   : > { %v354_v52 = vpack.c.bf16 %v338_v51, %v337_v50 }
  0x28   : > { %1383 = vmatmul.mubr.msk.bf16.gmra.mrb[4].mxu0 %vm378_vm0, %v342_v18 }
  0x29   : > { %1386 = vmatprep.mubr.msk.bf16.mxu0 %vm378_vm0, %v343_v19 }
  0x30   : > { %1387 = vmatmul.mubr.msk.bf16.gmra.mrb[8].mxu0 %vm378_vm0, %v344_v24 }
  0x31   : > { %1390 = vmatprep.mubr.msk.bf16.mxu0 %vm378_vm0, %v345_v25 }
  0x38   : > { %1391 = vmatmul.mubr.msk.bf16.gmra.mrb[12].mxu0 %vm378_vm0, %v346_v30 }
  0x39   : > { %1394 = vmatprep.mubr.msk.bf16.mxu0 %vm378_vm0, %v347_v31 }
  0x40   : > { %1395 = vmatmul.mubr.msk.bf16.gmra.mrb[16].mxu0 %vm378_vm0, %v348_v36 }
  0x41   : > { %1398 = vmatprep.mubr.msk.bf16.mxu0 %vm378_vm0, %v349_v37 }
  0x48   : > { %1399 = vmatmul.mubr.msk.bf16.gmra.mrb[20].mxu0 %vm378_vm0, %v350_v42 }
  0x49   : > { %1402 = vmatprep.mubr.msk.bf16.mxu0 %vm378_vm0, %v351_v43 }
  0x50   : > { %1403 = vmatmul.mubr.msk.bf16.gmra.mrb[24].mxu0 %vm378_vm0, %v352_v48 }
  0x51   : > { %1406 = vmatprep.mubr.msk.bf16.mxu0 %vm378_vm0, %v353_v49 }
  0x58   : > { %1407 = vmatmul.mubr.msk.bf16.gmra.mrb[28].mxu0 %vm378_vm0, %v354_v52 }
  0xf3   : > { %v1380_v56 = vpop.f32.mrb[0].mxu0 }
  0xf4   : > { %v470_v57 = vadd.f32 %v1380_v56, %v1790_v55  ;;  %v461_v58 = vpop.f32.mrb[1].mxu0 }
  0xf5   : > { %v462_v59 = vadd.f32 %v1790_v55, %v461_v58  ;;  %v1381_v60 = vpop.f32.mrb[2].mxu0 }
  0xf6   : > { %v473_v61 = vadd.f32 %v1381_v60, %v1790_v55  ;;  %v464_v62 = vpop.f32.mrb[3].mxu0  ;;  %v590_v0 = vmax.f32 %v470_v57, 0.0 }
  0xf7   : > { %v465_v63 = vadd.f32 %v1790_v55, %v464_v62  ;;  %v588_v2 = vmax.f32 %v462_v59, 0.0 }
  0xf8   : > { %v591_v1 = vmax.f32 %v473_v61, 0.0 }
  0xf9   : > { %v589_v3 = vmax.f32 %v465_v63, 0.0 }
  0xfa   : > { %v621_v4 = vpack.c.bf16 %v591_v1, %v590_v0 }
  0xfb   : > { %v1384_v5 = vpop.f32.mrb[4].mxu0  ;;  %v620_v6 = vpack.c.bf16 %v589_v3, %v588_v2 }
  0xfc   : > { %v486_v7 = vadd.f32 %v1384_v5, %v1790_v55  ;;  %v477_v8 = vpop.f32.mrb[5].mxu0 }
  0xfd   : > { %v478_v9 = vadd.f32 %v1790_v55, %v477_v8  ;;  %v1385_v10 = vpop.f32.mrb[6].mxu0  ;;  %1418 = vmatprep.mubr.msk.bf16.mxu1 %vm675_vm1, %v620_v6 }
  0xfe   : > { %v489_v11 = vadd.f32 %v1385_v10, %v1790_v55  ;;  %v480_v12 = vpop.f32.mrb[7].mxu0  ;;  %1419 = vmatmul.mubr.msk.bf16.vlgmr.msra.gmra.mrb[0].mxu1 %vm675_vm1, %v621_v4  ;;  %v594_v14 = vmax.f32 %v486_v7, 0.0 }
  0xff   : > { %v481_v13 = vadd.f32 %v1790_v55, %v480_v12  ;;  %v592_v16 = vmax.f32 %v478_v9, 0.0 }
 0x100   : > { %v595_v15 = vmax.f32 %v489_v11, 0.0 }
 0x101   : > { %v593_v17 = vmax.f32 %v481_v13, 0.0 }
 0x102   : > { %v623_v18 = vpack.c.bf16 %v595_v15, %v594_v14 }
 0x103   : > { %v622_v19 = vpack.c.bf16 %v593_v17, %v592_v16  ;;  %v1388_v20 = vpop.f32.mrb[8].mxu0 }
 0x104   : > { %v502_v21 = vadd.f32 %v1388_v20, %v1790_v55  ;;  %v493_v22 = vpop.f32.mrb[9].mxu0 }
 0x105   : > { %v494_v23 = vadd.f32 %v1790_v55, %v493_v22  ;;  %v1389_v24 = vpop.f32.mrb[10].mxu0  ;;  %1422 = vmatprep.mubr.msk.bf16.mxu1 %vm675_vm1, %v622_v19 }
 0x106   : > { %v505_v25 = vadd.f32 %v1389_v24, %v1790_v55  ;;  %v496_v26 = vpop.f32.mrb[11].mxu0  ;;  %1423 = vmatmul.mubr.msk.bf16.gmra.mrb[4].mxu1 %vm675_vm1, %v623_v18  ;;  %v598_v28 = vmax.f32 %v502_v21, 0.0 }
 0x107   : > { %v497_v27 = vadd.f32 %v1790_v55, %v496_v26  ;;  %v596_v30 = vmax.f32 %v494_v23, 0.0 }
 0x108   : > { %v599_v29 = vmax.f32 %v505_v25, 0.0 }
 0x109   : > { %v597_v31 = vmax.f32 %v497_v27, 0.0 }
 0x10a   : > { %v625_v32 = vpack.c.bf16 %v599_v29, %v598_v28 }
 0x10b   : > { %v624_v33 = vpack.c.bf16 %v597_v31, %v596_v30  ;;  %v1392_v34 = vpop.f32.mrb[12].mxu0 }
 0x10c   : > { %v518_v35 = vadd.f32 %v1392_v34, %v1790_v55  ;;  %v509_v36 = vpop.f32.mrb[13].mxu0 }
 0x10d   : > { %v510_v37 = vadd.f32 %v1790_v55, %v509_v36  ;;  %v1393_v38 = vpop.f32.mrb[14].mxu0  ;;  %1426 = vmatprep.mubr.msk.bf16.mxu1 %vm675_vm1, %v624_v33 }
 0x10e   : > { %v521_v39 = vadd.f32 %v1393_v38, %v1790_v55  ;;  %v512_v40 = vpop.f32.mrb[15].mxu0  ;;  %1427 = vmatmul.mubr.msk.bf16.gmra.mrb[8].mxu1 %vm675_vm1, %v625_v32  ;;  %v602_v42 = vmax.f32 %v518_v35, 0.0 }
 0x10f   : > { %v513_v41 = vadd.f32 %v1790_v55, %v512_v40  ;;  %v600_v44 = vmax.f32 %v510_v37, 0.0 }
 0x110   : > { %v603_v43 = vmax.f32 %v521_v39, 0.0 }
 0x111   : > { %v601_v45 = vmax.f32 %v513_v41, 0.0  ;;  %v1843_v41 = vld [vmem:[%s2012_s5] sm:$0x1] }
 0x112   : > { %v627_v46 = vpack.c.bf16 %v603_v43, %v602_v42  ;;  %1372 = vmatprep.mubr.msk.f32.mxu0 %vm378_vm0, %v1843_v41  ;;  %v918_v42 = vld [vmem:[#allocation2] sm:$0x1]  ;;  %v1617_v43 = vmov 0  }
 0x113   : > { %v626_v47 = vpack.c.bf16 %v601_v45, %v600_v44  ;;  %v1396_v48 = vpop.f32.mrb[16].mxu0  ;;  %1538 = vset.pattern.permute.xlu0 %v1617_v43 }
 0x114   : > { %v534_v49 = vadd.f32 %v1396_v48, %v1790_v55  ;;  %v525_v50 = vpop.f32.mrb[17].mxu0  ;;  %921 = vperm.xlu0 %1538, %v918_v42  }
 0x115   : > { %v526_v51 = vadd.f32 %v1790_v55, %v525_v50  ;;  %v1397_v52 = vpop.f32.mrb[18].mxu0  ;;  %1430 = vmatprep.mubr.msk.bf16.mxu1 %vm675_vm1, %v626_v47 }
 0x116   : > { %v537_v53 = vadd.f32 %v1397_v52, %v1790_v55  ;;  %v528_v54 = vpop.f32.mrb[19].mxu0  ;;  %1431 = vmatmul.mubr.msk.bf16.gmra.mrb[12].mxu1 %vm675_vm1, %v627_v46  ;;  %v606_v57 = vmax.f32 %v534_v49, 0.0 }
 0x117   : > { %v529_v56 = vadd.f32 %v1790_v55, %v528_v54  ;;  %v604_v59 = vmax.f32 %v526_v51, 0.0 }
 0x118   : > { %v607_v58 = vmax.f32 %v537_v53, 0.0 }
 0x119   : > { %v605_v60 = vmax.f32 %v529_v56, 0.0 }
 0x11a   : > { %v629_v61 = vpack.c.bf16 %v607_v58, %v606_v57 }
 0x11b   : > { %v628_v62 = vpack.c.bf16 %v605_v60, %v604_v59  ;;  %v1400_v63 = vpop.f32.mrb[20].mxu0 }
 0x11c   : > { %v550_v0 = vadd.f32 %v1400_v63, %v1790_v55  ;;  %v541_v1 = vpop.f32.mrb[21].mxu0 }
 0x11d   : > { %v542_v2 = vadd.f32 %v1790_v55, %v541_v1  ;;  %1434 = vmatprep.mubr.msk.bf16.mxu1 %vm675_vm1, %v628_v62  ;;  %v1401_v3 = vpop.f32.mrb[22].mxu0 }
 0x11e   : > { %v610_v4 = vmax.f32 %v550_v0, 0.0  ;;  %v553_v5 = vadd.f32 %v1401_v3, %v1790_v55  ;;  %1435 = vmatmul.mubr.msk.bf16.gmra.mrb[16].mxu1 %vm675_vm1, %v629_v61  ;;  %v544_v6 = vpop.f32.mrb[23].mxu0 }
 0x11f   : > { %v608_v7 = vmax.f32 %v542_v2, 0.0  ;;  %v545_v8 = vadd.f32 %v1790_v55, %v544_v6 }
 0x120   : > { %v611_v9 = vmax.f32 %v553_v5, 0.0 }
 0x121   : > { %v609_v10 = vmax.f32 %v545_v8, 0.0 }
 0x122   : > { %v631_v11 = vpack.c.bf16 %v611_v9, %v610_v4 }
 0x123   : > { %v630_v12 = vpack.c.bf16 %v609_v10, %v608_v7  ;;  %v1404_v13 = vpop.f32.mrb[24].mxu0 }
 0x124   : > { %v566_v14 = vadd.f32 %v1404_v13, %v1790_v55  ;;  %v557_v15 = vpop.f32.mrb[25].mxu0 }
 0x125   : > { %1438 = vmatprep.mubr.msk.bf16.mxu1 %vm675_vm1, %v630_v12  ;;  %v558_v16 = vadd.f32 %v1790_v55, %v557_v15  ;;  %v1405_v17 = vpop.f32.mrb[26].mxu0 }
 0x126   : > { %1439 = vmatmul.mubr.msk.bf16.gmra.mrb[20].mxu1 %vm675_vm1, %v631_v11  ;;  %v614_v18 = vmax.f32 %v566_v14, 0.0  ;;  %v569_v19 = vadd.f32 %v1405_v17, %v1790_v55  ;;  %v560_v20 = vpop.f32.mrb[27].mxu0 }
 0x127   : > { %v612_v21 = vmax.f32 %v558_v16, 0.0  ;;  %v561_v22 = vadd.f32 %v1790_v55, %v560_v20 }
 0x128   : > { %v615_v23 = vmax.f32 %v569_v19, 0.0 }
 0x129   : > { %v613_v24 = vmax.f32 %v561_v22, 0.0 }
 0x12a   : > { %v633_v25 = vpack.c.bf16 %v615_v23, %v614_v18 }
 0x12b   : > { %v632_v26 = vpack.c.bf16 %v613_v24, %v612_v21  ;;  %v1408_v27 = vpop.f32.mrb[28].mxu0 }
 0x12c   : > { %v582_v28 = vadd.f32 %v1408_v27, %v1790_v55  ;;  %v573_v29 = vpop.f32.mrb[29].mxu0 }
 0x12d   : > { %1442 = vmatprep.mubr.msk.bf16.mxu1 %vm675_vm1, %v632_v26  ;;  %v574_v30 = vadd.f32 %v1790_v55, %v573_v29  ;;  %v1409_v31 = vpop.f32.mrb[30].mxu0 }
 0x12e   : > { %1443 = vmatmul.mubr.msk.bf16.gmra.mrb[24].mxu1 %vm675_vm1, %v633_v25  ;;  %v618_v32 = vmax.f32 %v582_v28, 0.0  ;;  %v585_v33 = vadd.f32 %v1409_v31, %v1790_v55  ;;  %v576_v34 = vpop.f32.mrb[31].mxu0 }
 0x12f   : > { %v616_v35 = vmax.f32 %v574_v30, 0.0  ;;  %v577_v36 = vadd.f32 %v1790_v55, %v576_v34  ;;  %v1850_v55 = vld [vmem:[%s2011_s4] ss:$0 sm:$0xff] }
 0x130   : > { %v619_v37 = vmax.f32 %v585_v33, 0.0 }
 0x131   : > { %v617_v38 = vmax.f32 %v577_v36, 0.0 }
 0x132   : > { %v635_v39 = vpack.c.bf16 %v619_v37, %v618_v32 }
 0x133   : > { %v634_v40 = vpack.c.bf16 %v617_v38, %v616_v35 }
 0x135   : > { %1446 = vmatprep.mubr.msk.bf16.mxu1 %vm675_vm1, %v634_v40 }
 0x136   : > { %1447 = vmatmul.mubr.msk.bf16.gmra.mrb[28].mxu1 %vm675_vm1, %v635_v39 }
 0x1d1   : > { %v1420_v44 = vpop.f32.mrb[0].mxu1 }
 0x1d2   : > { %v767_v45 = vadd.f32 %v1420_v44, %v1850_v55  ;;  %v758_v46 = vpop.f32.mrb[1].mxu1 }
 0x1d3   : > { %v759_v47 = vadd.f32 %v1850_v55, %v758_v46  ;;  %v1421_v48 = vpop.f32.mrb[2].mxu1 }
 0x1d4   : > { %v770_v49 = vadd.f32 %v1421_v48, %v1850_v55  ;;  %v761_v50 = vpop.f32.mrb[3].mxu1  ;;  %v887_v52 = vmax.f32 %v767_v45, 0.0 }
 0x1d5   : > { %v762_v51 = vadd.f32 %v1850_v55, %v761_v50  ;;  %v885_v54 = vmax.f32 %v759_v47, 0.0 }
 0x1d6   : > { %v888_v53 = vmax.f32 %v770_v49, 0.0 }
 0x1d7   : > { %v886_v56 = vmax.f32 %v762_v51, 0.0 }
 0x1d8   : > { %v1856_v57 = vpack.c.bf16 %v888_v53, %v887_v52 }
 0x1d9   : > { %v1858_v58 = vpack.c.bf16 %v886_v56, %v885_v54  ;;  %v1424_v59 = vpop.f32.mrb[4].mxu1 }
 0x1da   : > { %v783_v60 = vadd.f32 %v1424_v59, %v1850_v55  ;;  %v774_v61 = vpop.f32.mrb[5].mxu1 }
 0x1db   : > { %v775_v62 = vadd.f32 %v1850_v55, %v774_v61  ;;  %v1425_v63 = vpop.f32.mrb[6].mxu1 }
 0x1dc   : > { %v786_v0 = vadd.f32 %v1425_v63, %v1850_v55  ;;  %v777_v1 = vpop.f32.mrb[7].mxu1  ;;  %v891_v3 = vmax.f32 %v783_v60, 0.0 }
 0x1dd   : > { %v778_v2 = vadd.f32 %v1850_v55, %v777_v1  ;;  %v889_v5 = vmax.f32 %v775_v62, 0.0 }
 0x1de   : > { %v892_v4 = vmax.f32 %v786_v0, 0.0 }
 0x1df   : > { %v890_v6 = vmax.f32 %v778_v2, 0.0 }
 0x1e0   : > { %v1864_v7 = vpack.c.bf16 %v892_v4, %v891_v3 }
 0x1e1   : > { %v1866_v8 = vpack.c.bf16 %v890_v6, %v889_v5  ;;  %v1428_v9 = vpop.f32.mrb[8].mxu1 }
 0x1e2   : > { %v799_v10 = vadd.f32 %v1428_v9, %v1850_v55  ;;  %v790_v11 = vpop.f32.mrb[9].mxu1 }
 0x1e3   : > { %v791_v12 = vadd.f32 %v1850_v55, %v790_v11  ;;  %v1429_v13 = vpop.f32.mrb[10].mxu1 }
 0x1e4   : > { %v802_v14 = vadd.f32 %v1429_v13, %v1850_v55  ;;  %v793_v15 = vpop.f32.mrb[11].mxu1  ;;  %v895_v17 = vmax.f32 %v799_v10, 0.0 }
 0x1e5   : > { %v794_v16 = vadd.f32 %v1850_v55, %v793_v15  ;;  %v893_v19 = vmax.f32 %v791_v12, 0.0 }
 0x1e6   : > { %v896_v18 = vmax.f32 %v802_v14, 0.0 }
 0x1e7   : > { %v894_v20 = vmax.f32 %v794_v16, 0.0 }
 0x1e8   : > { %v1872_v21 = vpack.c.bf16 %v896_v18, %v895_v17 }
 0x1e9   : > { %v1874_v22 = vpack.c.bf16 %v894_v20, %v893_v19  ;;  %v1432_v23 = vpop.f32.mrb[12].mxu1 }
 0x1ea   : > { %v815_v24 = vadd.f32 %v1432_v23, %v1850_v55  ;;  %v806_v25 = vpop.f32.mrb[13].mxu1 }
 0x1eb   : > { %v807_v26 = vadd.f32 %v1850_v55, %v806_v25  ;;  %v1433_v27 = vpop.f32.mrb[14].mxu1 }
 0x1ec   : > { %v818_v28 = vadd.f32 %v1433_v27, %v1850_v55  ;;  %v809_v29 = vpop.f32.mrb[15].mxu1  ;;  %v899_v31 = vmax.f32 %v815_v24, 0.0 }
 0x1ed   : > { %v810_v30 = vadd.f32 %v1850_v55, %v809_v29  ;;  %v897_v33 = vmax.f32 %v807_v26, 0.0 }
 0x1ee   : > { %v900_v32 = vmax.f32 %v818_v28, 0.0 }
 0x1ef   : > { %v898_v34 = vmax.f32 %v810_v30, 0.0 }
 0x1f0   : > { %v1880_v35 = vpack.c.bf16 %v900_v32, %v899_v31 }
 0x1f1   : > { %v1882_v36 = vpack.c.bf16 %v898_v34, %v897_v33  ;;  %v1436_v37 = vpop.f32.mrb[16].mxu1 }
 0x1f2   : > { %v831_v38 = vadd.f32 %v1436_v37, %v1850_v55  ;;  %v822_v39 = vpop.f32.mrb[17].mxu1 }
 0x1f3   : > { %v823_v40 = vadd.f32 %v1850_v55, %v822_v39  ;;  %v1437_v42 = vpop.f32.mrb[18].mxu1 }
 0x1f4   : > { %v834_v43 = vadd.f32 %v1437_v42, %v1850_v55  ;;  %v825_v44 = vpop.f32.mrb[19].mxu1  ;;  %v903_v46 = vmax.f32 %v831_v38, 0.0 }
 0x1f5   : > { %v826_v45 = vadd.f32 %v1850_v55, %v825_v44  ;;  %v901_v48 = vmax.f32 %v823_v40, 0.0 }
 0x1f6   : > { %v904_v47 = vmax.f32 %v834_v43, 0.0 }
 0x1f7   : > { %v902_v49 = vmax.f32 %v826_v45, 0.0 }
 0x1f8   : > { %v1456_v50 = vpack.c.bf16 %v904_v47, %v903_v46 }
 0x1f9   : > { %v1450_v52 = vpack.c.bf16 %v902_v49, %v901_v48  ;;  %v1440_v53 = vpop.f32.mrb[20].mxu1 }
 0x1fa   : > { %v847_v54 = vadd.f32 %v1440_v53, %v1850_v55  ;;  %v838_v56 = vpop.f32.mrb[21].mxu1 }
 0x1fb   : > { %v839_v59 = vadd.f32 %v1850_v55, %v838_v56  ;;  %1452 = vmatprep.subr.msk.bf16.mxu0 %vm1890_vm2, %v1450_v52  ;;  %v1441_v60 = vpop.f32.mrb[22].mxu1 }
 0x1fc   : > { %v907_v61 = vmax.f32 %v847_v54, 0.0  ;;  %v850_v62 = vadd.f32 %v1441_v60, %v1850_v55  ;;  %1455 = vmatpush3.bf16.xpose.msk.msra.mxu0 %vm1890_vm2, %v1858_v58  ;;  %v841_v63 = vpop.f32.mrb[23].mxu1 }
 0x1fd   : > { %v905_v0 = vmax.f32 %v839_v59, 0.0  ;;  %v842_v1 = vadd.f32 %v1850_v55, %v841_v63  ;;  %1458 = vmatprep.subr.msk.bf16.mxu0 %vm1890_vm2, %v1456_v50 }
 0x1fe   : > { %v908_v2 = vmax.f32 %v850_v62, 0.0 }
 0x1ff   : > { %v906_v3 = vmax.f32 %v842_v1, 0.0 }
 0x200   : > { %v1468_v4 = vpack.c.bf16 %v908_v2, %v907_v61 }
 0x201   : > { %v1462_v5 = vpack.c.bf16 %v906_v3, %v905_v0  ;;  %v1444_v6 = vpop.f32.mrb[24].mxu1 }
 0x202   : > { %v863_v9 = vadd.f32 %v1444_v6, %v1850_v55  ;;  %v854_v10 = vpop.f32.mrb[25].mxu1 }
 0x203   : > { %v855_v11 = vadd.f32 %v1850_v55, %v854_v10  ;;  %v1445_v12 = vpop.f32.mrb[26].mxu1 }
 0x204   : > { %1461 = vmatpush3.bf16.xpose.msk.msra.mxu0 %vm1890_vm2, %v1856_v57  ;;  %v911_v58 = vmax.f32 %v863_v9, 0.0  ;;  %v866_v13 = vadd.f32 %v1445_v12, %v1850_v55  ;;  %v857_v14 = vpop.f32.mrb[27].mxu1 }
 0x205   : > { %1464 = vmatprep.subr.msk.bf16.mxu0 %vm1890_vm2, %v1462_v5  ;;  %v909_v15 = vmax.f32 %v855_v11, 0.0  ;;  %v858_v16 = vadd.f32 %v1850_v55, %v857_v14 }
 0x206   : > { %v912_v17 = vmax.f32 %v866_v13, 0.0 }
 0x207   : > { %v910_v18 = vmax.f32 %v858_v16, 0.0 }
 0x208   : > { %v1480_v19 = vpack.c.bf16 %v912_v17, %v911_v58 }
 0x209   : > { %v1474_v20 = vpack.c.bf16 %v910_v18, %v909_v15  ;;  %v1448_v23 = vpop.f32.mrb[28].mxu1 }
 0x20a   : > { %v879_v24 = vadd.f32 %v1448_v23, %v1850_v55  ;;  %v870_v25 = vpop.f32.mrb[29].mxu1 }
 0x20b   : > { %v871_v57 = vadd.f32 %v1850_v55, %v870_v25  ;;  %v1449_v26 = vpop.f32.mrb[30].mxu1 }
 0x20c   : > { %1467 = vmatpush3.bf16.xpose.msk.msra.mxu0 %vm1890_vm2, %v1866_v8  ;;  %v915_v27 = vmax.f32 %v879_v24, 0.0  ;;  %v882_v28 = vadd.f32 %v1449_v26, %v1850_v55  ;;  %v873_v29 = vpop.f32.mrb[31].mxu1 }
 0x20d   : > { %1470 = vmatprep.subr.msk.bf16.mxu0 %vm1890_vm2, %v1468_v4  ;;  %v913_v30 = vmax.f32 %v871_v57, 0.0  ;;  %v874_v31 = vadd.f32 %v1850_v55, %v873_v29  ;;  %v924_v55 = vlaneseq }
 0x20e   : > { %v916_v32 = vmax.f32 %v882_v28, 0.0 }
 0x20f   : > { %v914_v33 = vmax.f32 %v874_v31, 0.0  ;;  %vm1130_vm3 = vcmp.lt.s32.totalorder %v924_v55, 256 }
 0x210   : > { %v1492_v34 = vpack.c.bf16 %v916_v32, %v915_v27 }
 0x211   : > { %v1486_v37 = vpack.c.bf16 %v914_v33, %v913_v30 }
 0x214   : > { %1473 = vmatpush3.bf16.xpose.msk.msra.mxu0 %vm1890_vm2, %v1864_v7  ;;  %v925_v7 = vshrl.u32 %v924_v55, 7 }
 0x215   : > { %1476 = vmatprep.subr.msk.bf16.mxu0 %vm1890_vm2, %v1474_v20 }
 0x216   : > { %v926_v8 = vsub.s32 0, %v925_v7 }
 0x21c   : > { %1479 = vmatpush3.bf16.xpose.msk.msra.mxu0 %vm1890_vm2, %v1874_v22 }
 0x21d   : > { %1482 = vmatprep.subr.msk.bf16.mxu0 %vm1890_vm2, %v1480_v19 }
 0x224   : > { %1485 = vmatpush3.bf16.xpose.msk.msra.mxu0 %vm1890_vm2, %v1872_v21  ;;  %v922_v21 = vpop.permute.xlu0 %921 }
 0x225   : > { %1488 = vmatprep.subr.msk.bf16.mxu0 %vm1890_vm2, %v1486_v37  ;;  %v927_v22 = vrot.slane %v922_v21, %v926_v8 }
 0x22c   : > { %1491 = vmatpush3.bf16.xpose.msk.msra.mxu0 %vm1890_vm2, %v1882_v36 }
 0x22d   : > { %1494 = vmatprep.subr.msk.bf16.mxu0 %vm1890_vm2, %v1492_v34 }
 0x234   : > { %1497 = vmatpush3.bf16.xpose.msk.msra.mxu0 %vm1890_vm2, %v1880_v35 }
 0x23b   : > { %1373 = vmatmul.mubr.msk.f32.vlgmr.msra.gmra.mrb[32].mxu0 %vm378_vm0, %v1843_v41  ;;  %v1618_v41 = vmov 1966171168  }
 0x23c   : > { %v1114_v47 = vunpack.c.l.s4 %v1618_v41 }
 0x23e   : > { %v1115_v48 = vunpack.c.0.s8 %v1114_v47 }
 0x240   : > { %v1118_v50 = vsub.s32 %v1115_v48, %v925_v7 }
 0x30e   : > { %v1093_v38 = vpop.f32.mrb[32].mxu0 }
 0x30f   : > { %v1094_v39 = vadd.f32 %v1093_v38, %v927_v22  ;;  %v1095_v40 = vpop.f32.mrb[33].mxu0 }
 0x310   : > { %v1096_v36 = vadd.f32 %v1095_v40, %v927_v22 }
 0x311   : > { %v1292_v42 = vmul.f32 -1.442695, %v1094_v39 }
 0x312   : > { %v1293_v43 = vmul.f32 -1.442695, %v1096_v36 }
 0x313   : > { %1545 = vpow2.f32 %v1292_v42 }
 0x314   : > { %1547 = vpow2.f32 %v1293_v43 }
 0x31d   : > { %v1546_v44 = vpop.eup %1545 }
 0x31e   : > { %v1548_v35 = vpop.eup %1547  ;;  %v1104_v45 = vadd.f32 1.0, %v1546_v44 }
 0x31f   : > { %v1105_v46 = vadd.f32 1.0, %v1548_v35 }
 0x320   : > { %1549 = vrcp.f32 %v1104_v45 }
 0x321   : > { %1551 = vrcp.f32 %v1105_v46 }
 0x32a   : > { %v1550_v49 = vpop.eup %1549 }
 0x32b   : > { %v1552_v51 = vpop.eup %1551 }
 0x32c   : > { %v1112_v52 = vcombine.low %v1550_v49, %v1552_v51  ;;  %1140 = sbr.rel (!%p1701_p5) target bundleno = 846 (0x34e), region = 52 }
 0x32e   : > { %v1119_v53 = vrot.slane %v1112_v52, %v1118_v50 }
 0x330   : > { %v1126_v54 = vrot.slane %v1119_v53, %v1118_v50 }
 0x332   : > { %1132 = vst.msk [vmem:[%s286_s30] sm:$0x3] %vm1130_vm3, %v1126_v54 }
 0x333   : > { %s2024_s14 = smov (!%p1143_p11, %s1142_s14), 2 }
 0x334   : > { %s1958_s15 = sshll.u32 %s2024_s14, 4 }
 0x335   : > { %s1147_s17 = ssub.s32 32, %s1958_s15 }
 0x336   : > { %1148 = vsyncadd %s1953_s9, %s1147_s17  ;;  %p1297_p12 = scmp.ne.s32.totalorder %s1958_s15, 0  ;;  %s1967_s12 = scalar_lea.hbm %s2014_s7, %s1715_s16 }
 0x337   : > { %s1153_s20 = sshll.u32 %s286_s30, 4  ;;  %s1619_s21 = smov [#allocation3]   ;;  %s1154_s20 = int_to_ptr.vmem [resolvable:$true] %s1153_s20 }
 0x338   : > { %s1553_s6 = scalar_lea.vmem %s1154_s20, %s1958_s15  ;;  %s1557_s22 = sshll.u32 %s1619_s21, 4  ;;  %s1558_s22 = int_to_ptr.vmem [resolvable:$false] %s1557_s22 }
 0x339   : > { %p1554_p13 = scmp.ne.s32.totalorder %s1154_s20, %s1553_s6  ;;  %s1559_s23 = scalar_lea.vmem %s1558_s22, 64 }
 0x33a   : > { %p1560_p2 = scmp.lt.s32.totalorder %s1154_s20, %s1558_s22  ;;  %p1561_p3 = scmp.lt.s32.totalorder %s1559_s23, %s1553_s6 }
 0x33b   : > { %p1555_p0 = pnand %p1554_p13, %p1297_p12 }
 0x33c   : > { %p1562_p4 = por %p1561_p3, %p1560_p2 }
 0x33d   : > { %p1556_p1 = pneg %p1555_p0 }
 0x33f   : > { %p1563_p5 = pnand %p1562_p4, %p1556_p1 }
 0x341   : > { %1566 = shalt.err (!%p1563_p5)
}
 0x342   : > { %s1567_s16 = scalar_lea.hbm %s1967_s12, %s1958_s15  ;;  %s1571_s30 = scalar_lea.hbm %s2014_s7, 48 }
 0x343   : > { %p1568_p7 = scmp.ne.s32.totalorder %s1967_s12, %s1567_s16  ;;  %p1572_p10 = scmp.lt.u32.totalorder %s1967_s12, %s2014_s7 }
 0x344   : > { %p1573_p11 = scmp.lt.u32.totalorder %s1571_s30, %s1567_s16  ;;  %p1575_p0 = scmp.lt.u32.totalorder %s1567_s16, %s1967_s12 }
 0x345   : > { %p1569_p8 = pnand %p1568_p7, %p1297_p12 }
 0x346   : > { %p1574_p13 = por %p1573_p11, %p1572_p10 }
 0x347   : > { %p1570_p9 = pneg %p1569_p8 }
 0x348   : > { %p1576_p1 = por %p1575_p0, %p1574_p13 }
 0x34a   : > { %p1577_p2 = pnand %p1576_p1, %p1570_p9 }
 0x34c   : > { %1580 = shalt.err (!%p1577_p2)
}
 0x34d   : > { %1156 = dma.vmem_to_hbm [thread:$0]  (%p1297_p12), %s1154_s20, %s1958_s15, %s1967_s12, %s1953_s9  }
 0x34e PF: > { %p1503_p3 = scmp.ge.s32.totalorder %s1615_s29, 2  ;;  %s1165_s17 = sand.u32 1, %s1603_s26  }
 0x34f   : > { %s1166_s18 = scalar_lea.sflag [#allocation4], %s1165_s17 }
 0x350   : > { %p1500_p4 = pnand %p1503_p3, %p1705_p6 }
 0x352   : > { %1598 = dma.done.wait (!%p1500_p4), %s1166_s18, 32  }
 0x353   : > { %1600 = vsyncadd (!%p1500_p4), %s1166_s18, 4294967264  ;;  %p19_p5 = scmp.ge.s32.totalorder %s1688_s8, 4   ;;  %s2019_s26 = smov %s1607_s27 }
 0x354   : > { %s2020_s27 = smov %s1611_s28  ;;  %s2021_s28 = smov %s1699_s11 }
 0x355   : > { %s2022_s29 = smov %s1688_s8  ;;  %21 = sbr.rel (!%p19_p5) target bundleno = 6 (0x6), region = 83 }
 0x35c   :  { %1171 = vsyncpa [#allocation4], 1 }
 0x35d   :  { %1173 = vsyncpa [#allocation4 + $0x1], 1 }

</bundles_post_ra>
